<compile_context>
chip_gen: v7x
topology: tpu7x:2x2x1
jax: 0.10.0
libtpu: 0.0.40
codegen_flags: <defaults>
</compile_context>

<pallas_src>
import functools

import jax
import jax.numpy as jnp
from jax import lax
from jax.experimental import pallas as pl
from jax.experimental.pallas import tpu as pltpu


def _round_up(x, m):
    return ((x + m - 1) // m) * m


def _attn_kernel(gamma2_ref, gamma3_ref, x_ref, w_ref, b_ref, o_ref, *,
                 cr, crp, c, n_valid, use_bf16):
    t = pl.program_id(0)

    g2 = gamma2_ref[t]          # per-frame gamma (AttentionConv2d.gamma)
    g3 = gamma3_ref[0]          # outer gamma (AttentionConv3dType2.gamma)
    c_a = g3 * g2               # coefficient on the attention term
    c_x = 1.0 + g3              # coefficient on the residual term

    w = w_ref[0]                # (Ktot, C)   fused [Wq; Wk; Wv] (row-padded)
    bias = b_ref[0]             # (Ktot, 1)   fused [bq; bk; bv] (row-padded)

    bb = x_ref.shape[1]         # frames (batch entries) per grid step
    npad = x_ref.shape[3]       # lane-padded spatial size

    for b in range(bb):         # static unroll over the batch block
        x = x_ref[0, b]                                         # (C, Npad)

        # Single fused projection matmul for q, k, v.
        qkv = jnp.dot(w, x, preferred_element_type=jnp.float32) + bias
        q = qkv[0:cr]                                           # (Cr, Npad)
        k = qkv[crp:crp + cr]                                   # (Cr, Npad)
        v = qkv[2 * crp:2 * crp + c]                            # (C,  Npad)

        if use_bf16:
            q = q.astype(jnp.bfloat16)
            k = k.astype(jnp.bfloat16)

        # s[i, j] = sum_r q[r, i] * k[r, j]  (contract over Cr, no transpose).
        s = lax.dot_general(q, k, (((0,), (0,)), ((), ())),
                            preferred_element_type=jnp.float32)  # (Npad, Npad)

        # Mask padded spatial rows out of the (column-wise) softmax.
        if n_valid != npad:
            row = lax.broadcasted_iota(jnp.int32, s.shape, 0)
            s = jnp.where(row < n_valid, s, -1e30)

        # torch.softmax(correlations, dim=1): normalize over the first N axis,
        # i.e. each column of the (N, N) score matrix sums to 1.  Denominator
        # is deferred until after the v @ e matmul.
        m = jnp.max(s, axis=0, keepdims=True)                    # (1, Npad)
        e = jnp.exp(s - m)                                       # (Npad, Npad)
        denom = jnp.sum(e, axis=0, keepdims=True)                # (1, Npad)

        if use_bf16:
            e = e.astype(jnp.bfloat16)
            v = v.astype(jnp.bfloat16)

        a = jnp.dot(v, e, preferred_element_type=jnp.float32)    # (C, Npad)
        inv = pl.reciprocal(denom, approx=True)                  # (1, Npad)

        # out = g3*(g2*A + x) + x == (g3*g2)*A + (1+g3)*x
        o_ref[0, b] = (c_a * (a * inv) + c_x * x).astype(o_ref.dtype)


def attention_conv3d_type2(x, params, *, use_bf16_matmul=False,
                           max_batch_block=8):
    """x: (B, C, T, H, W) float32. Returns same shape."""
    B, C, T, H, W = x.shape
    N = H * W
    Cr = params["wq"].shape[1]
    Crp = _round_up(Cr, 8)              # 8-sublane-aligned segment size
    Ktot = 2 * Crp + C                  # rows of the fused projection matrix
    Np = _round_up(N, 128)              # lane-dense spatial size

    # Pack x as (T, B, C, Np) so that per-frame weights are reused along the
    # inner grid axis and the output last dim is lane-dense.
    x_tb = jnp.transpose(x, (2, 0, 1, 3, 4)).reshape(T, B, C, N)
    if Np != N:
        x_tb = jnp.pad(x_tb, ((0, 0), (0, 0), (0, 0), (0, Np - N)))

    def pad_rows(a, rows):
        return jnp.pad(a, ((0, 0), (0, rows - a.shape[1]), (0, 0)))

    # Fused (and sublane-aligned) projection weights / biases.
    wqkv = jnp.concatenate(
        [pad_rows(params["wq"], Crp), pad_rows(params["wk"], Crp),
         params["wv"]], axis=1)                              # (T, Ktot, C)
    bqkv = jnp.concatenate(
        [pad_rows(params["bq"], Crp), pad_rows(params["bk"], Crp),
         params["bv"]], axis=1)                              # (T, Ktot, 1)

    # Frames per grid step (largest divisor of B up to max_batch_block).
    bb = 1
    for d in range(1, min(B, max_batch_block) + 1):
        if B % d == 0:
            bb = d
    nb = B // bb

    kernel = functools.partial(_attn_kernel, cr=Cr, crp=Crp, c=C,
                               n_valid=N, use_bf16=use_bf16_matmul)

    # Scoped-VMEM budget from the actual per-step footprint.
    f32b = 4
    est = (2 * 2 * bb * C * Np * f32b                    # x + out, double-buf
           + 2 * (Ktot * C + Ktot) * f32b                # weights + biases
           + (Ktot * Np + 2 * Np * Np + 2 * C * Np) * f32b  # qkv, s, e, a
           + (1 << 20))                                  # slack
    vmem_limit = int(min(max(2 * est, 32 * 1024 * 1024), 64 * 1024 * 1024))

    out = pl.pallas_call(
        kernel,
        out_shape=jax.ShapeDtypeStruct((T, B, C, Np), x.dtype),
        grid_spec=pltpu.PrefetchScalarGridSpec(
            num_scalar_prefetch=0,
            grid=(T, nb),
            in_specs=[
                pl.BlockSpec(memory_space=pltpu.MemorySpace.SMEM),   # gamma2 (T,)
                pl.BlockSpec(memory_space=pltpu.MemorySpace.SMEM),   # gamma3 (1,)
                pl.BlockSpec((1, bb, C, Np), lambda t, bi: (t, bi, 0, 0)),  # x
                pl.BlockSpec((1, Ktot, C), lambda t, bi: (t, 0, 0)),        # wqkv
                pl.BlockSpec((1, Ktot, 1), lambda t, bi: (t, 0, 0)),        # bqkv
            ],
            out_specs=pl.BlockSpec((1, bb, C, Np), lambda t, bi: (t, bi, 0, 0)),
        ),
        compiler_params=pltpu.CompilerParams(
            dimension_semantics=("parallel", "parallel"),
            vmem_limit_bytes=vmem_limit),
    )(params["gamma2"], params["gamma3"], x_tb, wqkv, bqkv)

    out = out[..., :N].reshape(T, B, C, H, W)
    return jnp.transpose(out, (1, 2, 0, 3, 4))


def reference(x, params):
    """Plain-JAX replica of the PyTorch forward pass, for verification."""
    B, C, T, H, W = x.shape
    N = H * W
    outs = []
    for t in range(T):
        xt = x[:, :, t].reshape(B, C, N)
        q = jnp.einsum('rc,bcn->brn', params["wq"][t], xt) + params["bq"][t][None]
        k = jnp.einsum('rc,bcn->brn', params["wk"][t], xt) + params["bk"][t][None]
        v = jnp.einsum('dc,bcn->bdn', params["wv"][t], xt) + params["bv"][t][None]
        s = jnp.einsum('bri,brj->bij', q, k)                 # (B, N, N)
        beta = jax.nn.softmax(s, axis=1)                     # torch dim=1
        a = jnp.einsum('bci,bij->bcj', v, beta)              # (B, C, N)
        out2d = params["gamma2"][t] * a + xt
        outs.append(out2d.reshape(B, C, H, W))
    stacked = jnp.stack(outs, axis=2)                        # (B, C, T, H, W)
    return params["gamma3"][0] * stacked + x


if __name__ == "__main__":
    B, C, T, H, W = 2, 4, 3, 8, 8
    reduction_ratio = 2.0
    Cr = int(C // reduction_ratio)

    key = jax.random.PRNGKey(0)
    keys = jax.random.split(key, 7)
    x = jax.random.normal(keys[0], (B, C, T, H, W), jnp.float32)

    params = {
        "wq": 0.2 * jax.random.normal(keys[1], (T, Cr, C), jnp.float32),
        "bq": 0.1 * jax.random.normal(keys[2], (T, Cr, 1), jnp.float32),
        "wk": 0.2 * jax.random.normal(keys[3], (T, Cr, C), jnp.float32),
        "bk": 0.1 * jax.random.normal(keys[4], (T, Cr, 1), jnp.float32),
        "wv": 0.2 * jax.random.normal(keys[5], (T, C, C), jnp.float32),
        "bv": 0.1 * jax.random.normal(keys[6], (T, C, 1), jnp.float32),
        # PyTorch __init__ sets per-frame gamma=0.0 and outer gamma=0.2; we use
        # deterministic nonzero per-frame gammas so the attention path is
        # actually exercised (otherwise the output reduces to 1.2*x).
        "gamma2": jnp.array([0.1 * (t + 1) for t in range(T)], jnp.float32),
        "gamma3": jnp.array([0.2], jnp.float32),
    }

    ref = reference(x, params)

    # f32 matmul path (tight check; approx reciprocal allows ~1e-3 slack).
    out = jax.block_until_ready(attention_conv3d_type2(x, params))
    assert out.shape == x.shape
    err = float(jnp.max(jnp.abs(out - ref)))
    assert jnp.allclose(out, ref, atol=1e-3, rtol=1e-3), f"f32 max abs err {err}"

    # bf16 matmul path (MXU full-rate variant; looser tolerance).
    out_bf = jax.block_until_ready(
        attention_conv3d_type2(x, params, use_bf16_matmul=True))
    err_bf = float(jnp.max(jnp.abs(out_bf - ref)))
    assert jnp.allclose(out_bf, ref, atol=5e-2, rtol=5e-2), \
        f"bf16 max abs err {err_bf}"

    print("KERNEL_OK")
</pallas_src>

<mosaic_0001>
module attributes {stable_mosaic.version = 11 : i64} {
  func.func @_attn_kernel(%arg0: i32, %arg1: i32, %arg2: memref<3xf32, #tpu.memory_space<smem>>, %arg3: memref<1xf32, #tpu.memory_space<smem>>, %arg4: memref<1x2x4x128xf32, #tpu.memory_space<vmem>>, %arg5: memref<1x20x4xf32, #tpu.memory_space<vmem>>, %arg6: memref<1x20x1xf32, #tpu.memory_space<vmem>>, %arg7: memref<1x2x4x128xf32, #tpu.memory_space<vmem>>) attributes {dimension_semantics = [#tpu.dimension_semantics<parallel>, #tpu.dimension_semantics<parallel>], iteration_bounds = array<i64: 3, 1>, scalar_prefetch = 0 : i64, scratch_operands = 0 : i64, tpu.core_type = #tpu.core_type<tc>, window_params = [{transform_indices = @transform_0, window_bounds = array<i64: 3>}, {transform_indices = @transform_1, window_bounds = array<i64: 1>}, {transform_indices = @transform_2, window_bounds = array<i64: 1, 2, 4, 128>}, {transform_indices = @transform_3, window_bounds = array<i64: 1, 20, 4>}, {transform_indices = @transform_4, window_bounds = array<i64: 1, 20, 1>}, {transform_indices = @transform_5, window_bounds = array<i64: 1, 2, 4, 128>}]} {
    %0 = arith.index_cast %arg0 : i32 to index
    %1 = memref.load %arg2[%0] : memref<3xf32, #tpu.memory_space<smem>>
    %c0 = arith.constant 0 : index
    %2 = memref.load %arg3[%c0] : memref<1xf32, #tpu.memory_space<smem>>
    %3 = arith.mulf %2, %1 : f32
    %cst = arith.constant 1.000000e+00 : f32
    %4 = arith.addf %cst, %2 : f32
    %c0_0 = arith.constant 0 : index
    %c0_1 = arith.constant 0 : index
    %c0_2 = arith.constant 0 : index
    %5 = vector.load %arg5[%c0_0, %c0_1, %c0_2] : memref<1x20x4xf32, #tpu.memory_space<vmem>>, vector<1x20x4xf32>
    %6 = vector.shape_cast %5 : vector<1x20x4xf32> to vector<20x4xf32>
    %c0_3 = arith.constant 0 : index
    %c0_4 = arith.constant 0 : index
    %c0_5 = arith.constant 0 : index
    %7 = vector.load %arg6[%c0_3, %c0_4, %c0_5] : memref<1x20x1xf32, #tpu.memory_space<vmem>>, vector<1x20x1xf32>
    %8 = vector.shape_cast %7 : vector<1x20x1xf32> to vector<20x1xf32>
    %c0_6 = arith.constant 0 : index
    %c0_7 = arith.constant 0 : index
    %c0_8 = arith.constant 0 : index
    %c0_9 = arith.constant 0 : index
    %9 = vector.load %arg4[%c0_6, %c0_7, %c0_8, %c0_9] : memref<1x2x4x128xf32, #tpu.memory_space<vmem>>, vector<1x1x4x128xf32>
    %10 = vector.shape_cast %9 : vector<1x1x4x128xf32> to vector<4x128xf32>
    %cst_10 = arith.constant dense<0.000000e+00> : vector<20x128xf32>
    %11 = tpu.matmul %6, %10, %cst_10 {dimension_numbers = #tpu.dot_dimension_numbers<[1], [0], [0], [1], [0, 0, 1, 1], [], []>} : vector<20x4xf32>, vector<4x128xf32>, vector<20x128xf32> -> vector<20x128xf32>
    %12 = vector.broadcast %8 : vector<20x1xf32> to vector<20x128xf32>
    %13 = arith.addf %11, %12 : vector<20x128xf32>
    %14 = vector.extract_strided_slice %13 {offsets = [0, 0], sizes = [2, 128], strides = [1, 1]} : vector<20x128xf32> to vector<2x128xf32>
    %15 = vector.extract_strided_slice %13 {offsets = [8, 0], sizes = [2, 128], strides = [1, 1]} : vector<20x128xf32> to vector<2x128xf32>
    %16 = vector.extract_strided_slice %13 {offsets = [16, 0], sizes = [4, 128], strides = [1, 1]} : vector<20x128xf32> to vector<4x128xf32>
    %cst_11 = arith.constant dense<0.000000e+00> : vector<128x128xf32>
    %17 = tpu.matmul %14, %15, %cst_11 {dimension_numbers = #tpu.dot_dimension_numbers<[0], [0], [1], [1], [0, 1, 1, 1], [], []>} : vector<2x128xf32>, vector<2x128xf32>, vector<128x128xf32> -> vector<128x128xf32>
    %18 = tpu.iota {dimensions = array<i32: 0>} : vector<128x128xi32>
    %c64_i32 = arith.constant 64 : i32
    %19 = vector.broadcast %c64_i32 : i32 to vector<128x128xi32>
    %20 = arith.cmpi slt, %18, %19 : vector<128x128xi32>
    %cst_12 = arith.constant -1.000000e+30 : f32
    %21 = vector.broadcast %cst_12 : f32 to vector<128x128xf32>
    %22 = arith.select %20, %17, %21 : vector<128x128xi1>, vector<128x128xf32>
    %cst_13 = arith.constant dense<0xFF800000> : vector<128xf32>
    %23 = vector.multi_reduction <maximumf>, %22, %cst_13 [0] : vector<128x128xf32> to vector<128xf32>
    %24 = vector.shape_cast %23 : vector<128xf32> to vector<1x128xf32>
    %25 = vector.broadcast %24 : vector<1x128xf32> to vector<128x128xf32>
    %26 = arith.subf %22, %25 : vector<128x128xf32>
    %27 = math.exp %26 : vector<128x128xf32>
    %cst_14 = arith.constant dense<0.000000e+00> : vector<128xf32>
    %28 = vector.multi_reduction <add>, %27, %cst_14 [0] : vector<128x128xf32> to vector<128xf32>
    %29 = vector.shape_cast %28 : vector<128xf32> to vector<1x128xf32>
    %cst_15 = arith.constant dense<0.000000e+00> : vector<4x128xf32>
    %30 = tpu.matmul %16, %27, %cst_15 {dimension_numbers = #tpu.dot_dimension_numbers<[1], [0], [0], [1], [0, 0, 1, 1], [], []>} : vector<4x128xf32>, vector<128x128xf32>, vector<4x128xf32> -> vector<4x128xf32>
    %31 = tpu.reciprocal %29 {approx = true} : vector<1x128xf32> -> vector<1x128xf32>
    %32 = vector.broadcast %31 : vector<1x128xf32> to vector<4x128xf32>
    %33 = arith.mulf %30, %32 : vector<4x128xf32>
    %34 = vector.broadcast %3 : f32 to vector<4x128xf32>
    %35 = arith.mulf %34, %33 : vector<4x128xf32>
    %36 = vector.broadcast %4 : f32 to vector<4x128xf32>
    %37 = arith.mulf %36, %10 : vector<4x128xf32>
    %38 = arith.addf %35, %37 : vector<4x128xf32>
    %c0_16 = arith.constant 0 : index
    %c0_17 = arith.constant 0 : index
    %c0_18 = arith.constant 0 : index
    %c0_19 = arith.constant 0 : index
    %39 = vector.load %arg7[%c0_16, %c0_17, %c0_18, %c0_19] : memref<1x2x4x128xf32, #tpu.memory_space<vmem>>, vector<1x1x4x128xf32>
    %40 = vector.shape_cast %39 : vector<1x1x4x128xf32> to vector<4x128xf32>
    %41 = vector.shape_cast %38 : vector<4x128xf32> to vector<1x1x4x128xf32>
    tpu.vector_store %arg7[%c0_16, %c0_17, %c0_18, %c0_19], %41 {strides = array<i32>} : memref<1x2x4x128xf32, #tpu.memory_space<vmem>>, vector<1x1x4x128xf32>,
    %c0_20 = arith.constant 0 : index
    %c1 = arith.constant 1 : index
    %c0_21 = arith.constant 0 : index
    %c0_22 = arith.constant 0 : index
    %42 = vector.load %arg4[%c0_20, %c1, %c0_21, %c0_22] : memref<1x2x4x128xf32, #tpu.memory_space<vmem>>, vector<1x1x4x128xf32>
    %43 = vector.shape_cast %42 : vector<1x1x4x128xf32> to vector<4x128xf32>
    %cst_23 = arith.constant dense<0.000000e+00> : vector<20x128xf32>
    %44 = tpu.matmul %6, %43, %cst_23 {dimension_numbers = #tpu.dot_dimension_numbers<[1], [0], [0], [1], [0, 0, 1, 1], [], []>} : vector<20x4xf32>, vector<4x128xf32>, vector<20x128xf32> -> vector<20x128xf32>
    %45 = vector.broadcast %8 : vector<20x1xf32> to vector<20x128xf32>
    %46 = arith.addf %44, %45 : vector<20x128xf32>
    %47 = vector.extract_strided_slice %46 {offsets = [0, 0], sizes = [2, 128], strides = [1, 1]} : vector<20x128xf32> to vector<2x128xf32>
    %48 = vector.extract_strided_slice %46 {offsets = [8, 0], sizes = [2, 128], strides = [1, 1]} : vector<20x128xf32> to vector<2x128xf32>
    %49 = vector.extract_strided_slice %46 {offsets = [16, 0], sizes = [4, 128], strides = [1, 1]} : vector<20x128xf32> to vector<4x128xf32>
    %cst_24 = arith.constant dense<0.000000e+00> : vector<128x128xf32>
    %50 = tpu.matmul %47, %48, %cst_24 {dimension_numbers = #tpu.dot_dimension_numbers<[0], [0], [1], [1], [0, 1, 1, 1], [], []>} : vector<2x128xf32>, vector<2x128xf32>, vector<128x128xf32> -> vector<128x128xf32>
    %51 = tpu.iota {dimensions = array<i32: 0>} : vector<128x128xi32>
    %c64_i32_25 = arith.constant 64 : i32
    %52 = vector.broadcast %c64_i32_25 : i32 to vector<128x128xi32>
    %53 = arith.cmpi slt, %51, %52 : vector<128x128xi32>
    %cst_26 = arith.constant -1.000000e+30 : f32
    %54 = vector.broadcast %cst_26 : f32 to vector<128x128xf32>
    %55 = arith.select %53, %50, %54 : vector<128x128xi1>, vector<128x128xf32>
    %cst_27 = arith.constant dense<0xFF800000> : vector<128xf32>
    %56 = vector.multi_reduction <maximumf>, %55, %cst_27 [0] : vector<128x128xf32> to vector<128xf32>
    %57 = vector.shape_cast %56 : vector<128xf32> to vector<1x128xf32>
    %58 = vector.broadcast %57 : vector<1x128xf32> to vector<128x128xf32>
    %59 = arith.subf %55, %58 : vector<128x128xf32>
    %60 = math.exp %59 : vector<128x128xf32>
    %cst_28 = arith.constant dense<0.000000e+00> : vector<128xf32>
    %61 = vector.multi_reduction <add>, %60, %cst_28 [0] : vector<128x128xf32> to vector<128xf32>
    %62 = vector.shape_cast %61 : vector<128xf32> to vector<1x128xf32>
    %cst_29 = arith.constant dense<0.000000e+00> : vector<4x128xf32>
    %63 = tpu.matmul %49, %60, %cst_29 {dimension_numbers = #tpu.dot_dimension_numbers<[1], [0], [0], [1], [0, 0, 1, 1], [], []>} : vector<4x128xf32>, vector<128x128xf32>, vector<4x128xf32> -> vector<4x128xf32>
    %64 = tpu.reciprocal %62 {approx = true} : vector<1x128xf32> -> vector<1x128xf32>
    %65 = vector.broadcast %64 : vector<1x128xf32> to vector<4x128xf32>
    %66 = arith.mulf %63, %65 : vector<4x128xf32>
    %67 = vector.broadcast %3 : f32 to vector<4x128xf32>
    %68 = arith.mulf %67, %66 : vector<4x128xf32>
    %69 = vector.broadcast %4 : f32 to vector<4x128xf32>
    %70 = arith.mulf %69, %43 : vector<4x128xf32>
    %71 = arith.addf %68, %70 : vector<4x128xf32>
    %c0_30 = arith.constant 0 : index
    %c1_31 = arith.constant 1 : index
    %c0_32 = arith.constant 0 : index
    %c0_33 = arith.constant 0 : index
    %72 = vector.load %arg7[%c0_30, %c1_31, %c0_32, %c0_33] : memref<1x2x4x128xf32, #tpu.memory_space<vmem>>, vector<1x1x4x128xf32>
    %73 = vector.shape_cast %72 : vector<1x1x4x128xf32> to vector<4x128xf32>
    %74 = vector.shape_cast %71 : vector<4x128xf32> to vector<1x1x4x128xf32>
    tpu.vector_store %arg7[%c0_30, %c1_31, %c0_32, %c0_33], %74 {strides = array<i32>} : memref<1x2x4x128xf32, #tpu.memory_space<vmem>>, vector<1x1x4x128xf32>,
    return
  }
  func.func @transform_0(%arg0: i32, %arg1: i32) -> i32 {
    %c0_i32 = arith.constant 0 : i32
    %c0_i32_0 = arith.constant 0 : i32
    return %c0_i32 : i32
  }
  func.func @transform_1(%arg0: i32, %arg1: i32) -> i32 {
    %c0_i32 = arith.constant 0 : i32
    %c0_i32_0 = arith.constant 0 : i32
    return %c0_i32 : i32
  }
  func.func @transform_2(%arg0: i32, %arg1: i32) -> (i32, i32, i32, i32) {
    %c0_i32 = arith.constant 0 : i32
    %c0_i32_0 = arith.constant 0 : i32
    %c0_i32_1 = arith.constant 0 : i32
    return %arg0, %arg1, %c0_i32, %c0_i32_0 : i32, i32, i32, i32
  }
  func.func @transform_3(%arg0: i32, %arg1: i32) -> (i32, i32, i32) {
    %c0_i32 = arith.constant 0 : i32
    %c0_i32_0 = arith.constant 0 : i32
    %c0_i32_1 = arith.constant 0 : i32
    return %arg0, %c0_i32, %c0_i32_0 : i32, i32, i32
  }
  func.func @transform_4(%arg0: i32, %arg1: i32) -> (i32, i32, i32) {
    %c0_i32 = arith.constant 0 : i32
    %c0_i32_0 = arith.constant 0 : i32
    %c0_i32_1 = arith.constant 0 : i32
    return %arg0, %c0_i32, %c0_i32_0 : i32, i32, i32
  }
  func.func @transform_5(%arg0: i32, %arg1: i32) -> (i32, i32, i32, i32) {
    %c0_i32 = arith.constant 0 : i32
    %c0_i32_0 = arith.constant 0 : i32
    %c0_i32_1 = arith.constant 0 : i32
    return %arg0, %arg1, %c0_i32, %c0_i32_0 : i32, i32, i32, i32
  }
}

</mosaic_0001>

<bundles_post_ra>
// kernel: tpu_custom_call.1
= control target key start
LH: loop header
LB: loop body
LE: loop exit
PB: predicated region body
PF: predicated region fallthrough
CT: control target
= control target key end

     0   :  { %s2365_s0 = inlined_call_operand.vmem [shape: f32[3], index: 0, kind: input, shape index: {}]   ;;  %s2366_s1 = inlined_call_operand.<no memory space> [shape: f32[1], index: 1, kind: input, shape index: {}]   ;;  %s2367_s2 = inlined_call_operand.vmem [shape: f32[3,2,4,128], index: 2, kind: input, shape index: {}]   ;;  %s2368_s3 = inlined_call_operand.vmem [shape: f32[3,20,4], index: 3, kind: input, shape index: {}]   ;;  %s2369_s4 = inlined_call_operand.vmem [shape: f32[3,20,1], index: 4, kind: input, shape index: {}]   ;;  %s2370_s5 = inlined_call_operand.hbm [shape: f32[3,2,4,128], index: 5, kind: output, shape index: {}]  }
   0x1   :  { %10 = sst [smem:[#allocation2]] %s2366_s1 }
   0x2   :  { %11 = vsyncpa [#allocation5], 0 }
   0x3   :  { %12 = vsyncpa [#allocation4], 0 }
   0x4   :  { %14 = vsyncpa [#allocation4 + $0x1], 0  ;;  %s2089_s20 = smov 0   ;;  %s2091_s21 = smov 0  }
   0x5   :  { %s2093_s22 = smov 0   ;;  %s2095_s23 = smov 0  }
   0x6   :  { %s2097_s24 = smov 0   ;;  %s2099_s25 = smov 0  }
   0x7 LB: > { %s1503_s1 = sadd.s32 4294967295, %s2046_s25   ;;  %s1504_s26 = sadd.s32 4294967294, %s2046_s25   ;;  %s2046_s25 = sphi %s2099_s25, %s20_s25   ;;  %s2042_s24 = sphi %s2097_s24, %s2379_s24   ;;  %s2038_s23 = sphi %s2095_s23, %s2378_s23   ;;  %s2034_s22 = sphi %s2093_s22, %s2377_s22   ;;  %s2030_s21 = sphi %s2091_s21, %s2376_s21   ;;  %s2026_s20 = sphi %s2089_s20, %s2375_s20  }
   0x8   : > { %s32_s27 = sadd.s32 1, %s2042_s24  ;;  %s163_s28 = sadd.s32 1, %s2034_s22 }
   0x9   : > { %p34_p0 = scmp.ge.s32.totalorder %s32_s27, 3  ;;  %p173_p1 = scmp.ne.s32.totalorder %s2034_s22, %s2030_s21 }
   0xa   : > { %p174_p2 = scmp.eq.s32.totalorder %s1503_s1, 2  ;;  %p179_p3 = scmp.ne.s32.totalorder %s2030_s21, %s2026_s20 }
   0xb   : > { %s2381_s27 = smov (%p34_p0, %s32_s27), 0  ;;  %p180_p5 = scmp.eq.s32.totalorder %s1504_s26, 2 }
   0xc   : > { %p2129_p4 = por %p174_p2, %p173_p1  ;;  %s158_s30 = ssub.s32 %s2042_s24, %s2381_s27 }
   0xd   : > { %p1505_p6 = scmp.ge.s32.totalorder %s2046_s25, 1  ;;  %p161_p7 = scmp.eq.s32.totalorder %s158_s30, 0 }
   0xe   : > { %p2136_p8 = por %p180_p5, %p179_p3  ;;  %p187_p9 = scmp.lt.s32.totalorder %s2046_s25, 4 }
   0xf   : > { %s2142_s7 = scalar_select %p161_p7, %s2034_s22, %s163_s28  }
  0x10   : > { %p2144_p10 = pnand %p1505_p6, %p187_p9  ;;  %p2148_p11 = scmp.eq.s32.totalorder %s1503_s1, 0 }
  0x11   : > { %s200_s12 = sshll.u32 %s2365_s0, 4  ;;  %s201_s12 = int_to_ptr.vmem [resolvable:$true] %s200_s12 }
  0x12   : > { %p1841_p12 = pneg %p2144_p10  ;;  %s1949_s13 = scalar_lea.vmem %s201_s12, 16 }
  0x13   : > { %p1950_p0 = scmp.ne.s32.totalorder %s201_s12, %s1949_s13  ;;  %p1957_p5 = scmp.lt.s32.totalorder %s201_s12, %s201_s12 }
  0x14   : > { %p1842_p13 = pnand %p2148_p11, %p1841_p12  ;;  %p1958_p6 = scmp.lt.s32.totalorder %s1949_s13, %s1949_s13 }
  0x16   : > { %p1951_p1 = pneg %p1842_p13  ;;  %p1959_p7 = por %p1958_p6, %p1957_p5 }
  0x18   : > { %p1952_p2 = pnand %p1951_p1, %p1950_p0 }
  0x1a   : > { %p1953_p3 = pneg %p1952_p2 }
  0x1c   : > { %p1960_p9 = pnand %p1959_p7, %p1953_p3 }
  0x1e   : > { %1963 = shalt.err (!%p1960_p9)
}
  0x1f   : > { %s2048_s14 = smov [#allocation3]   ;;  %245 = sbr.rel (%p2144_p10) target bundleno = 1344 (0x540), region = 40 }
  0x20   : > { %1844 = dma.vmem_to_smem (!%p1842_p13), %s201_s12, 16, %s2048_s14, [#allocation5]  }
  0x26   : > { %2017 = dma.done.wait (%p2148_p11), [#allocation5], 16  }
  0x27   : > { %2019 = vsyncadd (%p2148_p11), [#allocation5], 4294967280 }
  0x28   : > { %251 = sfence }
  0x29   : > { %p289_p12 = scmp.lt.s32.totalorder %s2038_s23, 2  ;;  %v2049_v0 = vmov 0.0   ;;  %vm2050_vm0 = vmmov 0   ;;  %v2051_v1 = vmov 0   ;;  %vm345_vm1 = vcmask 1043456   ;;  %s310_s11 = sld [smem:[#allocation2]] }
  0x2a   : > { %1642 = vmatprep.subr.mxu0 %v2049_v0  ;;  %1644 = vmatprep.mubr.msk.f32.mxu0 %vm2050_vm0, %v2049_v0  ;;  %vm335_vm2 = vcmask 31744   ;;  %vm510_vm3 = vcmask 1041408   ;;  %vm461_vm4 = vcmask 15360   ;;  %v2052_v34 = vmov 0.0|0.0   ;;  %s309_s12 = sld [smem:[#allocation3 + %s2038_s23]]  ;;  %s1565_s19 = sshll.u32 %s2038_s23, 7 }
  0x2b   : > { %s290_s15 = scalar_select %p289_p12, %s2038_s23, 2  ;;  %1907 = vset.pattern.permute.xlu0 %v2051_v1 }
  0x2c   : > { %s2314_s28 = scalar_lea.hbm %s2370_s5, %s1565_s19  ;;  %s2053_s23 = smov [#allocation6]  }
  0x2d   : > { %s1564_s16 = sshll.u32 %s290_s15, 3  ;;  %s1834_s17 = smul.u32 24, %s290_s15 }
  0x2e   : > { %s2173_s1 = scalar_lea.vmem %s2367_s2, %s1564_s16  ;;  %s285_s15 = sand.u32 1, %s2030_s21  }
  0x2f   : > { %v2176_v2 = vld [vmem:[%s2173_s1] sm:$0xf]  ;;  %s302_s30 = scalar_lea.vmem %s2368_s3, %s1834_s17  ;;  %s307_s10 = scalar_lea.vmem %s2369_s4, %s1834_s17  ;;  %v2212_v18 = vld [vmem:[%s2173_s1 + $0x4] sm:$0xf] }
  0x30   : > { %1643 = vmatpush3.msk.msra.mxu0 %vm345_vm1, %v2176_v2  ;;  %v2183_v3 = vld [vmem:[%s302_s30] sm:$0xff]  ;;  %v2192_v5 = vld [vmem:[%s302_s30 + $0x8] sm:$0xff]  ;;  %v315_v15 = vld [vmem:[%s302_s30 + $0x10] sm:$0xf]  ;;  %s312_s13 = sadd.f32 1.0, %s310_s11  ;;  %s311_s14 = smul.f32 %s310_s11, %s309_s12 }
  0x31   : > { %1645 = vmatmul.mubr.msk.f32.vlgmr.msra.gmra.mrb[0].mxu0 %vm335_vm2, %v2183_v3  ;;  %v316_v4 = vld [vmem:[%s307_s10] sm:$0xff]  ;;  %v317_v6 = vld [vmem:[%s307_s10 + $0x8] sm:$0xff]  ;;  %v318_v16 = vld [vmem:[%s307_s10 + $0x10] sm:$0xf]  ;;  %1786 = vmatprep.subr.bf16.mxu0 %v2052_v34  ;;  %s1510_s16 = sshll.u32 %s285_s15, 3  ;;  %s2319_s30 = scalar_lea.sflag [#allocation4], %s285_s15 }
  0x32   : > { %1647 = vmatprep.mubr.msk.f32.mxu0 %vm2050_vm0, %v2049_v0  ;;  %322 = vperm.xlu0 %1907, %v316_v4   ;;  %s2284_s17 = scalar_lea.vmem [#allocation6], %s1510_s16  ;;  %s1968_s9 = sshll.u32 %s2053_s23, 4  ;;  %s1969_s9 = int_to_ptr.vmem [resolvable:$false] %s1968_s9 }
  0x33   : > { %s1388_s18 = sshll.u32 %s2284_s17, 4  ;;  %s1970_s10 = scalar_lea.vmem %s1969_s9, 256  ;;  %s2309_s18 = int_to_ptr.vmem [resolvable:$true] %s1388_s18 }
  0x34   : > { %s1964_s8 = scalar_lea.vmem %s2309_s18, 128  ;;  %p1971_p0 = scmp.lt.s32.totalorder %s2309_s18, %s1969_s9 }
  0x35   : > { %1648 = vmatmul.mubr.msk.f32.gmra.mrb[2].mxu0 %vm335_vm2, %v2192_v5  ;;  %p1965_p10 = scmp.ne.s32.totalorder %s2309_s18, %s1964_s8  ;;  %p1972_p1 = scmp.lt.s32.totalorder %s1970_s10, %s1964_s8 }
  0x36   : > { %327 = vperm.xlu0 %1907, %v317_v6   ;;  %1650 = vmatprep.mubr.msk.f32.mxu0 %vm2050_vm0, %v2049_v0 }
  0x37   : > { %p1966_p11 = pnand %p1965_p10, %p2129_p4  ;;  %p1973_p2 = por %p1972_p1, %p1971_p0 }
  0x39   : > { %1651 = vmatmul.mubr.msk.f32.gmra.mrb[4].mxu0 %vm335_vm2, %v315_v15  ;;  %p1967_p13 = pneg %p1966_p11 }
  0x3a   : > { %1711 = vmatprep.mubr.msk.f32.mxu0 %vm2050_vm0, %v2049_v0 }
  0x3b   : > { %p1974_p3 = pnand %p1973_p2, %p1967_p13 }
  0xb1   : > { %v2198_v7 = vpop.permute.xlu0 %322 }
  0xb5   : > { %v2201_v11 = vpop.permute.xlu0 %327 }
 0x104   : > { %v415_v8 = vpop.f32.mrb[0].mxu0 }
 0x105   : > { %v1646_v9 = vpop.f32.mrb[1].mxu0  ;;  %v416_v10 = vadd.f32 %v415_v8, %v2198_v7 }
 0x107   : > { %429 = vxpose.xlu1.b32.start.end [1/1] (short) %v416_v10, 128 }
 0x108   : > { %v420_v12 = vpop.f32.mrb[2].mxu0 }
 0x109   : > { %v421_v13 = vadd.f32 %v420_v12, %v2201_v11  ;;  %v1649_v14 = vpop.f32.mrb[3].mxu0 }
 0x10b   : > { %1653 = vmatprep.subr.msk.mxu1 %vm510_vm3, %v421_v13 }
 0x10c   : > { %1654 = vmatpush3.msk.msra.mxu1 %vm510_vm3, %v421_v13  ;;  %v2246_v35 = vpop.f32.mrb[4].mxu0 }
 0x10d   : > { %1714 = vmatprep.subr.mxu1 %v2049_v0  ;;  %v1652_v36 = vpop.f32.mrb[5].mxu0 }
 0x125   : > { %1908 = vset.pattern.permute.xlu1 %v2051_v1 }
 0x161   : > { %332 = vperm.xlu1 %1908, %v318_v16  }
 0x187   : > { %v445_v17 = vpop.trf.xlu1 }
 0x188   : > { %1655 = vmatprep.mubr.msk.f32.mxu1 %vm461_vm4, %v445_v17 }
 0x18b   : > { %v446_v19 = vpop.trf.xlu1 }
 0x18c   : > { %1656 = vmatmul.mubr.msk.f32.vlgmr.msra.gmra.mrb[0].mxu1 %vm461_vm4, %v446_v19 }
 0x18d   : > { %1715 = vmatpush3.msk.msra.mxu1 %vm345_vm1, %v2212_v18 }
 0x18e   : > { %1810 = vmatprep.subr.bf16.mxu1 %v2052_v34 }
 0x18f   : > { %v447_v20 = vpop.trf.xlu1 }
 0x190   : > { %1658 = vmatprep.mubr.msk.f32.mxu1 %vm461_vm4, %v447_v20 }
 0x193   : > { %v448_v21 = vpop.trf.xlu1 }
 0x194   : > { %1659 = vmatmul.mubr.msk.f32.gmra.mrb[2].mxu1 %vm461_vm4, %v448_v21 }
 0x197   : > { %v449_v22 = vpop.trf.xlu1 }
 0x198   : > { %1661 = vmatprep.mubr.msk.f32.mxu1 %vm461_vm4, %v449_v22 }
 0x19b   : > { %v450_v23 = vpop.trf.xlu1 }
 0x19c   : > { %1662 = vmatmul.mubr.msk.f32.gmra.mrb[4].mxu1 %vm461_vm4, %v450_v23 }
 0x19f   : > { %v451_v24 = vpop.trf.xlu1 }
 0x1a0   : > { %1664 = vmatprep.mubr.msk.f32.mxu1 %vm461_vm4, %v451_v24 }
 0x1a3   : > { %v452_v25 = vpop.trf.xlu1 }
 0x1a4   : > { %1665 = vmatmul.mubr.msk.f32.gmra.mrb[6].mxu1 %vm461_vm4, %v452_v25 }
 0x1a7   : > { %v453_v26 = vpop.trf.xlu1 }
 0x1a8   : > { %1667 = vmatprep.mubr.msk.f32.mxu1 %vm461_vm4, %v453_v26 }
 0x1ab   : > { %v454_v27 = vpop.trf.xlu1 }
 0x1ac   : > { %1668 = vmatmul.mubr.msk.f32.gmra.mrb[8].mxu1 %vm461_vm4, %v454_v27 }
 0x1af   : > { %v455_v28 = vpop.trf.xlu1 }
 0x1b0   : > { %1670 = vmatprep.mubr.msk.f32.mxu1 %vm461_vm4, %v455_v28 }
 0x1b3   : > { %v456_v29 = vpop.trf.xlu1 }
 0x1b4   : > { %1671 = vmatmul.mubr.msk.f32.gmra.mrb[10].mxu1 %vm461_vm4, %v456_v29 }
 0x1b7   : > { %v457_v30 = vpop.trf.xlu1 }
 0x1b8   : > { %1673 = vmatprep.mubr.msk.f32.mxu1 %vm461_vm4, %v457_v30 }
 0x1bb   : > { %v458_v31 = vpop.trf.xlu1 }
 0x1bc   : > { %1674 = vmatmul.mubr.msk.f32.gmra.mrb[12].mxu1 %vm461_vm4, %v458_v31 }
 0x1bf   : > { %v459_v32 = vpop.trf.xlu1 }
 0x1c0   : > { %1676 = vmatprep.mubr.msk.f32.mxu1 %vm461_vm4, %v459_v32 }
 0x1c3   : > { %v460_v33 = vpop.trf.xlu1 }
 0x1c4   : > { %1677 = vmatmul.mubr.msk.f32.gmra.mrb[14].mxu1 %vm461_vm4, %v460_v33 }
 0x1c5   : > { %1716 = vmatprep.mubr.msk.f32.mxu1 %vm2050_vm0, %v2049_v0 }
 0x1c8   : > { %1717 = vmatmul.mubr.msk.f32.vlgmr.msra.gmra.mrb[16].mxu1 %vm335_vm2, %v2183_v3 }
 0x1c9   : > { %1719 = vmatprep.mubr.msk.f32.mxu1 %vm2050_vm0, %v2049_v0 }
 0x1cc   : > { %1720 = vmatmul.mubr.msk.f32.gmra.mrb[18].mxu1 %vm335_vm2, %v2192_v5 }
 0x1cd   : > { %1722 = vmatprep.mubr.msk.f32.mxu1 %vm2050_vm0, %v2049_v0 }
 0x1d0   : > { %1723 = vmatmul.mubr.msk.f32.gmra.mrb[20].mxu1 %vm335_vm2, %v315_v15 }
 0x1d1   : > { %1783 = vmatprep.mubr.msk.f32.mxu1 %vm2050_vm0, %v2049_v0 }
 0x25f   : > { %v1657_v37 = vpop.f32.mrb[0].mxu1 }
 0x260   : > { %v580_v38 = vpop.f32.mrb[1].mxu1 }
 0x267   : > { %v1660_v39 = vpop.f32.mrb[2].mxu1 }
 0x268   : > { %v590_v40 = vpop.f32.mrb[3].mxu1 }
 0x26f   : > { %v1663_v41 = vpop.f32.mrb[4].mxu1 }
 0x270   : > { %v709_v42 = vmax.f32 %v1657_v37, %v1663_v41  ;;  %v600_v43 = vpop.f32.mrb[5].mxu1 }
 0x271   : > { %v708_v44 = vmax.f32 %v580_v38, %v600_v43 }
 0x272   : > { %v713_v45 = vmax.f32 %v709_v42, -1e+30 }
 0x273   : > { %v712_v46 = vmax.f32 %v708_v44, -1e+30 }
 0x274   : > { %v717_v47 = vmax.f32 %v713_v45, -1e+30 }
 0x275   : > { %v716_v48 = vmax.f32 %v712_v46, -1e+30 }
 0x277   : > { %v720_v49 = vmax.f32 %v716_v48, %v717_v47  ;;  %v1666_v50 = vpop.f32.mrb[6].mxu1 }
 0x278   : > { %v711_v51 = vmax.f32 %v1660_v39, %v1666_v50  ;;  %v610_v52 = vpop.f32.mrb[7].mxu1 }
 0x279   : > { %v710_v53 = vmax.f32 %v590_v40, %v610_v52 }
 0x27a   : > { %v715_v54 = vmax.f32 %v711_v51, -1e+30 }
 0x27b   : > { %v714_v55 = vmax.f32 %v710_v53, -1e+30 }
 0x27c   : > { %v719_v56 = vmax.f32 %v715_v54, -1e+30 }
 0x27d   : > { %v718_v57 = vmax.f32 %v714_v55, -1e+30 }
 0x27f   : > { %v721_v58 = vmax.f32 %v718_v57, %v719_v56  ;;  %v1669_v59 = vpop.f32.mrb[8].mxu1 }
 0x280   : > { %v620_v60 = vpop.f32.mrb[9].mxu1 }
 0x281   : > { %v722_v61 = vmax.f32 %v720_v49, %v721_v58 }
 0x283   : > { %v723_v62 = vrot.slane %v722_v61, 4 }
 0x285   : > { %v724_v63 = vmax.f32 %v722_v61, %v723_v62 }
 0x287   : > { %v725_v0 = vrot.slane %v724_v63, 2  ;;  %v1672_v1 = vpop.f32.mrb[10].mxu1 }
 0x288   : > { %v630_v3 = vpop.f32.mrb[11].mxu1 }
 0x289   : > { %v726_v4 = vmax.f32 %v724_v63, %v725_v0 }
 0x28b   : > { %v727_v5 = vrot.slane %v726_v4, 1 }
 0x28d   : > { %v728_v6 = vmax.f32 %v726_v4, %v727_v5  ;;  %v2257_v4 = vpop.permute.xlu1 %332 }
 0x28f   : > { %v729_v8 = vsub.f32 %v580_v38, %v728_v6  ;;  %v730_v9 = vsub.f32 %v1657_v37, %v728_v6  ;;  %v731_v10 = vsub.f32 %v590_v40, %v728_v6  ;;  %v732_v12 = vsub.f32 %v1660_v39, %v728_v6  ;;  %v1675_v13 = vpop.f32.mrb[12].mxu1 }
 0x290   : > { %v733_v14 = vsub.f32 %v600_v43, %v728_v6  ;;  %v734_v15 = vsub.f32 %v1663_v41, %v728_v6  ;;  %v735_v16 = vsub.f32 %v610_v52, %v728_v6  ;;  %v736_v17 = vsub.f32 %v1666_v50, %v728_v6  ;;  %v640_v19 = vpop.f32.mrb[13].mxu1 }
 0x291   : > { %v745_v20 = vmul.f32 1.442695, %v729_v8  ;;  %v747_v21 = vmul.f32 1.442695, %v730_v9  ;;  %v749_v22 = vmul.f32 1.442695, %v731_v10  ;;  %v426_v9 = vadd.f32 %v2246_v35, %v2257_v4 }
 0x292   : > { %v751_v23 = vmul.f32 1.442695, %v732_v12  ;;  %v753_v24 = vmul.f32 1.442695, %v733_v14  ;;  %v755_v25 = vmul.f32 1.442695, %v734_v15 }
 0x293   : > { %1909 = vpow2.f32 %v745_v20  ;;  %v757_v26 = vmul.f32 1.442695, %v735_v16  ;;  %v759_v27 = vmul.f32 1.442695, %v736_v17  ;;  %v737_v30 = vsub.f32 -1e+30, %v728_v6 }
 0x294   : > { %1911 = vpow2.f32 %v747_v21 }
 0x295   : > { %1913 = vpow2.f32 %v749_v22  ;;  %v761_v38 = vmul.f32 1.442695, %v737_v30 }
 0x296   : > { %1915 = vpow2.f32 %v751_v23 }
 0x297   : > { %1917 = vpow2.f32 %v753_v24  ;;  %v1678_v28 = vpop.f32.mrb[14].mxu1  ;;  %v2274_v24 = vstv %s312_s13 }
 0x298   : > { %1919 = vpow2.f32 %v755_v25  ;;  %v650_v29 = vpop.f32.mrb[15].mxu1  ;;  %v873_v28 = vmul.f32 %v2274_v24, %v2176_v2 }
 0x299   : > { %1921 = vpow2.f32 %v757_v26 }
 0x29a   : > { %1923 = vpow2.f32 %v759_v27  ;;  %v2277_v27 = vstv %s311_s14 }
 0x29b   : > { %v947_v31 = vpop.f32.mrb[16].mxu1  ;;  %1925 = vpow2.f32 %v761_v38 }
 0x29c   : > { %v948_v32 = vadd.f32 %v947_v31, %v2198_v7  ;;  %v1718_v33 = vpop.f32.mrb[17].mxu1 }
 0x29d   : > { %v1910_v36 = vpop.eup %1909 }
 0x29e   : > { %v1912_v37 = vpop.eup %1911  ;;  %961 = vxpose.xlu0.b32.start.end [1/1] (short) %v948_v32, 128 }
 0x29f   : > { %v1914_v39 = vpop.eup %1913  ;;  %v777_v40 = vadd.f32 %v1912_v37, %v1910_v36  ;;  %v952_v41 = vpop.f32.mrb[18].mxu1  ;;  %v1787_v42 = vpack.c.bf16 %v1912_v37, %v1910_v36 }
 0x2a0   : > { %v1916_v43 = vpop.eup %1915  ;;  %v1721_v44 = vpop.f32.mrb[19].mxu1  ;;  %v953_v8 = vadd.f32 %v952_v41, %v2201_v11 }
 0x2a1   : > { %v1918_v45 = vpop.eup %1917  ;;  %v778_v46 = vadd.f32 %v1914_v39, %v777_v40  ;;  %1788 = vmatpush3.bf16.msra.mxu0 %v1787_v42  ;;  %v1790_v47 = vpack.c.bf16 %v1916_v43, %v1914_v39 }
 0x2a2   : > { %v1920_v48 = vpop.eup %1919  ;;  %1789 = vmatprep.subr.bf16.mxu0 %v2052_v34 }
 0x2a3   : > { %v1922_v7 = vpop.eup %1921  ;;  %v779_v49 = vadd.f32 %v1916_v43, %v778_v46  ;;  %v1793_v50 = vpack.c.bf16 %v1920_v48, %v1918_v45  ;;  %v2251_v55 = vpop.f32.mrb[20].mxu1 }
 0x2a4   : > { %v1924_v51 = vpop.eup %1923  ;;  %v1724_v56 = vpop.f32.mrb[21].mxu1 }
 0x2a5   : > { %v780_v52 = vadd.f32 %v1918_v45, %v779_v49  ;;  %1791 = vmatpush3.bf16.msra.mxu0 %v1790_v47  ;;  %v1796_v53 = vpack.c.bf16 %v1924_v51, %v1922_v7  ;;  %v1926_v59 = vpop.eup %1925 }
 0x2a6   : > { %1792 = vmatprep.subr.bf16.mxu0 %v2052_v34  ;;  %v1799_v62 = vpack.c.bf16 %v1926_v59, %v1926_v59 }
 0x2a7   : > { %v781_v54 = vadd.f32 %v1920_v48, %v780_v52 }
 0x2a9   : > { %v782_v57 = vadd.f32 %v1922_v7, %v781_v54  ;;  %1794 = vmatpush3.bf16.msra.mxu0 %v1793_v50 }
 0x2aa   : > { %1795 = vmatprep.subr.bf16.mxu0 %v2052_v34 }
 0x2ab   : > { %v783_v58 = vadd.f32 %v1924_v51, %v782_v57 }
 0x2ad   : > { %v784_v60 = vadd.f32 %v1926_v59, %v783_v58  ;;  %1797 = vmatpush3.bf16.msra.mxu0 %v1796_v53 }
 0x2ae   : > { %1798 = vmatprep.subr.bf16.mxu0 %v2052_v34 }
 0x2af   : > { %v785_v61 = vadd.f32 %v1926_v59, %v784_v60 }
 0x2b1   : > { %v786_v63 = vadd.f32 %v1926_v59, %v785_v61  ;;  %1800 = vmatpush3.bf16.msra.mxu0 %v1799_v62 }
 0x2b2   : > { %1801 = vmatprep.subr.bf16.mxu0 %v2052_v34 }
 0x2b3   : > { %v787_v0 = vadd.f32 %v1926_v59, %v786_v63 }
 0x2b5   : > { %1803 = vmatpush3.bf16.msra.mxu0 %v1799_v62  ;;  %v788_v1 = vadd.f32 %v1926_v59, %v787_v0 }
 0x2b6   : > { %1804 = vmatprep.subr.bf16.mxu0 %v2052_v34 }
 0x2b7   : > { %v789_v3 = vadd.f32 %v1926_v59, %v788_v1 }
 0x2b9   : > { %1806 = vmatpush3.bf16.msra.mxu0 %v1799_v62  ;;  %v790_v5 = vadd.f32 %v1926_v59, %v789_v3 }
 0x2ba   : > { %1807 = vmatprep.subr.bf16.mxu0 %v2052_v34 }
 0x2bb   : > { %v791_v6 = vadd.f32 %v1926_v59, %v790_v5 }
 0x2bd   : > { %1809 = vmatpush3.bf16.msra.mxu0 %v1799_v62  ;;  %v792_v17 = vrot.slane %v791_v6, 4 }
 0x2be   : > { %1725 = vmatprep.subr.msk.mxu0 %vm510_vm3, %v953_v8 }
 0x2bf   : > { %v793_v19 = vadd.f32 %v792_v17, %v791_v6 }
 0x2c0   : > { %1712 = vmatmul.mubr.f32.vlgmr.msra.gmra.mrb[6].mxu0 %v426_v9 }
 0x2c1   : > { %1726 = vmatpush3.msk.msra.mxu0 %vm510_vm3, %v953_v8  ;;  %v794_v20 = vrot.slane %v793_v19, 2 }
 0x2c3   : > { %v795_v21 = vadd.f32 %v794_v20, %v793_v19 }
 0x2c5   : > { %v796_v22 = vrot.slane %v795_v21, 1 }
 0x2c7   : > { %v797_v23 = vadd.f32 %v796_v22, %v795_v21 }
 0x2c9   : > { %1927 = vrcp.f32 %v797_v23 }
 0x2d3   : > { %v1928_v25 = vpop.eup %1927 }
 0x31e   : > { %v977_v10 = vpop.trf.xlu0 }
 0x31f   : > { %1727 = vmatprep.mubr.msk.f32.mxu0 %vm461_vm4, %v977_v10 }
 0x322   : > { %v978_v12 = vpop.trf.xlu0 }
 0x323   : > { %1728 = vmatmul.mubr.msk.f32.vlgmr.msra.gmra.mrb[8].mxu0 %vm461_vm4, %v978_v12 }
 0x326   : > { %v979_v13 = vpop.trf.xlu0 }
 0x327   : > { %1730 = vmatprep.mubr.msk.f32.mxu0 %vm461_vm4, %v979_v13 }
 0x32a   : > { %v980_v14 = vpop.trf.xlu0 }
 0x32b   : > { %1731 = vmatmul.mubr.msk.f32.gmra.mrb[10].mxu0 %vm461_vm4, %v980_v14 }
 0x32e   : > { %v981_v11 = vpop.trf.xlu0 }
 0x32f   : > { %1733 = vmatprep.mubr.msk.f32.mxu0 %vm461_vm4, %v981_v11 }
 0x332   : > { %v982_v35 = vpop.trf.xlu0 }
 0x333   : > { %1734 = vmatmul.mubr.msk.f32.gmra.mrb[12].mxu0 %vm461_vm4, %v982_v35 }
 0x336   : > { %v983_v15 = vpop.trf.xlu0 }
 0x337   : > { %1736 = vmatprep.mubr.msk.f32.mxu0 %vm461_vm4, %v983_v15 }
 0x33a   : > { %v984_v16 = vpop.trf.xlu0 }
 0x33b   : > { %1737 = vmatmul.mubr.msk.f32.gmra.mrb[14].mxu0 %vm461_vm4, %v984_v16 }
 0x33e   : > { %v985_v33 = vpop.trf.xlu0 }
 0x33f   : > { %1739 = vmatprep.mubr.msk.f32.mxu0 %vm461_vm4, %v985_v33 }
 0x342   : > { %v986_v36 = vpop.trf.xlu0 }
 0x343   : > { %1740 = vmatmul.mubr.msk.f32.gmra.mrb[16].mxu0 %vm461_vm4, %v986_v36 }
 0x346   : > { %v987_v37 = vpop.trf.xlu0 }
 0x347   : > { %1742 = vmatprep.mubr.msk.f32.mxu0 %vm461_vm4, %v987_v37 }
 0x34a   : > { %v988_v2 = vpop.trf.xlu0 }
 0x34b   : > { %1743 = vmatmul.mubr.msk.f32.gmra.mrb[18].mxu0 %vm461_vm4, %v988_v2 }
 0x34e   : > { %v989_v38 = vpop.trf.xlu0 }
 0x34f   : > { %1745 = vmatprep.mubr.msk.f32.mxu0 %vm461_vm4, %v989_v38 }
 0x352   : > { %v990_v39 = vpop.trf.xlu0 }
 0x353   : > { %1746 = vmatmul.mubr.msk.f32.gmra.mrb[20].mxu0 %vm461_vm4, %v990_v39 }
 0x356   : > { %v991_v40 = vpop.trf.xlu0 }
 0x357   : > { %1748 = vmatprep.mubr.msk.f32.mxu0 %vm461_vm4, %v991_v40 }
 0x35a   : > { %v992_v41 = vpop.trf.xlu0 }
 0x35b   : > { %1749 = vmatmul.mubr.msk.f32.gmra.mrb[22].mxu0 %vm461_vm4, %v992_v41 }
 0x393   : > { %v864_v26 = vpop.f32.mrb[6].mxu0 }
 0x394   : > { %v869_v29 = vmul.f32 %v1928_v25, %v864_v26  ;;  %v1713_v30 = vpop.f32.mrb[7].mxu0 }
 0x396   : > { %v871_v31 = vmul.f32 %v2277_v27, %v869_v29 }
 0x398   : > { %v874_v32 = vadd.f32 %v873_v28, %v871_v31 }
 0x39a   : > { %875 = vst [vmem:[%s2284_s17] sm:$0xf] %v874_v32 }
 0x3f6   : > { %v1729_v42 = vpop.f32.mrb[8].mxu0 }
 0x3f7   : > { %v1110_v43 = vpop.f32.mrb[9].mxu0 }
 0x3fe   : > { %v1732_v44 = vpop.f32.mrb[10].mxu0 }
 0x3ff   : > { %v1120_v45 = vpop.f32.mrb[11].mxu0 }
 0x406   : > { %v1735_v46 = vpop.f32.mrb[12].mxu0 }
 0x407   : > { %v1206_v47 = vmax.f32 %v1729_v42, %v1735_v46  ;;  %v1130_v48 = vpop.f32.mrb[13].mxu0 }
 0x408   : > { %v1205_v7 = vmax.f32 %v1110_v43, %v1130_v48 }
 0x409   : > { %v1210_v49 = vmax.f32 %v1206_v47, -1e+30 }
 0x40a   : > { %v1209_v50 = vmax.f32 %v1205_v7, -1e+30 }
 0x40b   : > { %v1214_v51 = vmax.f32 %v1210_v49, -1e+30 }
 0x40c   : > { %v1213_v52 = vmax.f32 %v1209_v50, -1e+30 }
 0x40e   : > { %v1217_v53 = vmax.f32 %v1213_v52, %v1214_v51  ;;  %v1738_v54 = vpop.f32.mrb[14].mxu0 }
 0x40f   : > { %v1208_v56 = vmax.f32 %v1732_v44, %v1738_v54  ;;  %v1140_v57 = vpop.f32.mrb[15].mxu0 }
 0x410   : > { %v1207_v58 = vmax.f32 %v1120_v45, %v1140_v57 }
 0x411   : > { %v1212_v59 = vmax.f32 %v1208_v56, -1e+30 }
 0x412   : > { %v1211_v60 = vmax.f32 %v1207_v58, -1e+30 }
 0x413   : > { %v1216_v61 = vmax.f32 %v1212_v59, -1e+30 }
 0x414   : > { %v1215_v62 = vmax.f32 %v1211_v60, -1e+30  ;;  %v958_v60 = vadd.f32 %v2251_v55, %v2257_v4 }
 0x416   : > { %v1218_v63 = vmax.f32 %v1215_v62, %v1216_v61  ;;  %v1741_v61 = vpop.f32.mrb[16].mxu0 }
 0x417   : > { %v1150_v62 = vpop.f32.mrb[17].mxu0 }
 0x418   : > { %v1219_v0 = vmax.f32 %v1217_v53, %v1218_v63 }
 0x41a   : > { %v1220_v1 = vrot.slane %v1219_v0, 4 }
 0x41c   : > { %v1221_v3 = vmax.f32 %v1219_v0, %v1220_v1 }
 0x41e   : > { %v1222_v5 = vrot.slane %v1221_v3, 2  ;;  %v1744_v63 = vpop.f32.mrb[18].mxu0 }
 0x41f   : > { %v1160_v0 = vpop.f32.mrb[19].mxu0 }
 0x420   : > { %v1223_v6 = vmax.f32 %v1221_v3, %v1222_v5 }
 0x422   : > { %v1224_v8 = vrot.slane %v1223_v6, 1 }
 0x424   : > { %v1225_v9 = vmax.f32 %v1223_v6, %v1224_v8 }
 0x426   : > { %v1226_v10 = vsub.f32 %v1110_v43, %v1225_v9  ;;  %v1227_v12 = vsub.f32 %v1729_v42, %v1225_v9  ;;  %v1228_v13 = vsub.f32 %v1120_v45, %v1225_v9  ;;  %v1229_v14 = vsub.f32 %v1732_v44, %v1225_v9  ;;  %v1747_v1 = vpop.f32.mrb[20].mxu0 }
 0x427   : > { %v1230_v11 = vsub.f32 %v1130_v48, %v1225_v9  ;;  %v1231_v35 = vsub.f32 %v1735_v46, %v1225_v9  ;;  %v1232_v15 = vsub.f32 %v1140_v57, %v1225_v9  ;;  %v1233_v16 = vsub.f32 %v1738_v54, %v1225_v9  ;;  %v1170_v3 = vpop.f32.mrb[21].mxu0 }
 0x428   : > { %v1242_v17 = vmul.f32 1.442695, %v1226_v10  ;;  %v1244_v19 = vmul.f32 1.442695, %v1227_v12  ;;  %v1246_v20 = vmul.f32 1.442695, %v1228_v13 }
 0x429   : > { %v1248_v21 = vmul.f32 1.442695, %v1229_v14  ;;  %v1250_v22 = vmul.f32 1.442695, %v1230_v11  ;;  %v1252_v23 = vmul.f32 1.442695, %v1231_v35  ;;  %v1368_v14 = vmul.f32 %v2212_v18, %v2274_v24 }
 0x42a   : > { %1929 = vpow2.f32 %v1242_v17  ;;  %v1254_v25 = vmul.f32 1.442695, %v1232_v15  ;;  %v1256_v26 = vmul.f32 1.442695, %v1233_v16  ;;  %v1234_v28 = vsub.f32 -1e+30, %v1225_v9 }
 0x42b   : > { %1931 = vpow2.f32 %v1244_v19 }
 0x42c   : > { %1933 = vpow2.f32 %v1246_v20  ;;  %v1258_v31 = vmul.f32 1.442695, %v1234_v28 }
 0x42d   : > { %1935 = vpow2.f32 %v1248_v21 }
 0x42e   : > { %1937 = vpow2.f32 %v1250_v22  ;;  %v1750_v5 = vpop.f32.mrb[22].mxu0 }
 0x42f   : > { %1939 = vpow2.f32 %v1252_v23  ;;  %v1180_v6 = vpop.f32.mrb[23].mxu0 }
 0x430   : > { %1941 = vpow2.f32 %v1254_v25 }
 0x431   : > { %1943 = vpow2.f32 %v1256_v26 }
 0x432   : > { %1945 = vpow2.f32 %v1258_v31 }
 0x434   : > { %v1930_v29 = vpop.eup %1929 }
 0x435   : > { %v1932_v30 = vpop.eup %1931 }
 0x436   : > { %v1934_v32 = vpop.eup %1933  ;;  %v1274_v33 = vadd.f32 %v1932_v30, %v1930_v29  ;;  %v1811_v36 = vpack.c.bf16 %v1932_v30, %v1930_v29 }
 0x437   : > { %v1936_v37 = vpop.eup %1935 }
 0x438   : > { %v1938_v2 = vpop.eup %1937  ;;  %v1275_v38 = vadd.f32 %v1934_v32, %v1274_v33  ;;  %1812 = vmatpush3.bf16.msra.mxu1 %v1811_v36  ;;  %v1814_v39 = vpack.c.bf16 %v1936_v37, %v1934_v32 }
 0x439   : > { %v1940_v40 = vpop.eup %1939  ;;  %1813 = vmatprep.subr.bf16.mxu1 %v2052_v34 }
 0x43a   : > { %v1942_v41 = vpop.eup %1941  ;;  %v1276_v42 = vadd.f32 %v1936_v37, %v1275_v38  ;;  %v1817_v43 = vpack.c.bf16 %v1940_v40, %v1938_v2 }
 0x43b   : > { %v1944_v44 = vpop.eup %1943 }
 0x43c   : > { %v1277_v45 = vadd.f32 %v1938_v2, %v1276_v42  ;;  %1815 = vmatpush3.bf16.msra.mxu1 %v1814_v39  ;;  %v1820_v46 = vpack.c.bf16 %v1944_v44, %v1942_v41  ;;  %v1946_v49 = vpop.eup %1945 }
 0x43d   : > { %1816 = vmatprep.subr.bf16.mxu1 %v2052_v34  ;;  %v1823_v52 = vpack.c.bf16 %v1946_v49, %v1946_v49 }
 0x43e   : > { %v1278_v47 = vadd.f32 %v1940_v40, %v1277_v45 }
 0x440   : > { %v1279_v48 = vadd.f32 %v1942_v41, %v1278_v47  ;;  %1818 = vmatpush3.bf16.msra.mxu1 %v1817_v43 }
 0x441   : > { %1819 = vmatprep.subr.bf16.mxu1 %v2052_v34 }
 0x442   : > { %v1280_v7 = vadd.f32 %v1944_v44, %v1279_v48 }
 0x444   : > { %v1281_v50 = vadd.f32 %v1946_v49, %v1280_v7  ;;  %1821 = vmatpush3.bf16.msra.mxu1 %v1820_v46 }
 0x445   : > { %1822 = vmatprep.subr.bf16.mxu1 %v2052_v34 }
 0x446   : > { %v1282_v51 = vadd.f32 %v1946_v49, %v1281_v50 }
 0x448   : > { %v1283_v53 = vadd.f32 %v1946_v49, %v1282_v51  ;;  %1824 = vmatpush3.bf16.msra.mxu1 %v1823_v52 }
 0x449   : > { %1825 = vmatprep.subr.bf16.mxu1 %v2052_v34 }
 0x44a   : > { %v1284_v54 = vadd.f32 %v1946_v49, %v1283_v53 }
 0x44c   : > { %1827 = vmatpush3.bf16.msra.mxu1 %v1823_v52  ;;  %v1285_v56 = vadd.f32 %v1946_v49, %v1284_v54 }
 0x44d   : > { %1828 = vmatprep.subr.bf16.mxu1 %v2052_v34 }
 0x44e   : > { %v1286_v57 = vadd.f32 %v1946_v49, %v1285_v56 }
 0x450   : > { %1830 = vmatpush3.bf16.msra.mxu1 %v1823_v52  ;;  %v1287_v58 = vadd.f32 %v1946_v49, %v1286_v57 }
 0x451   : > { %1831 = vmatprep.subr.bf16.mxu1 %v2052_v34 }
 0x452   : > { %v1288_v59 = vadd.f32 %v1946_v49, %v1287_v58 }
 0x454   : > { %1833 = vmatpush3.bf16.msra.mxu1 %v1823_v52  ;;  %v1289_v8 = vrot.slane %v1288_v59, 4 }
 0x456   : > { %v1290_v9 = vadd.f32 %v1289_v8, %v1288_v59 }
 0x457   : > { %1784 = vmatmul.mubr.f32.vlgmr.msra.gmra.mrb[22].mxu1 %v958_v60 }
 0x458   : > { %v1291_v10 = vrot.slane %v1290_v9, 2 }
 0x45a   : > { %v1292_v34 = vadd.f32 %v1291_v10, %v1290_v9 }
 0x45c   : > { %v1293_v12 = vrot.slane %v1292_v34, 1 }
 0x45e   : > { %v1294_v13 = vadd.f32 %v1293_v12, %v1292_v34 }
 0x460   : > { %1947 = vrcp.f32 %v1294_v13 }
 0x46a   : > { %v1948_v55 = vpop.eup %1947 }
 0x52a   : > { %v1361_v4 = vpop.f32.mrb[22].mxu1 }
 0x52b   : > { %v1366_v11 = vmul.f32 %v1948_v55, %v1361_v4  ;;  %v1785_v35 = vpop.f32.mrb[23].mxu1 }
 0x52d   : > { %v1367_v15 = vmul.f32 %v1366_v11, %v2277_v27 }
 0x52f   : > { %v1369_v16 = vadd.f32 %v1368_v14, %v1367_v15 }
 0x531   : > { %1558 = vst [vmem:[%s2284_s17 + $0x4] sm:$0xf] %v1369_v16 }
 0x532   : > { %1977 = shalt.err (!%p1974_p3)
}
 0x533   : > { %s1978_s11 = scalar_lea.hbm %s2314_s28, 128  ;;  %s1982_s14 = scalar_lea.hbm %s2370_s5, 384 }
 0x534   : > { %p1979_p5 = scmp.ne.s32.totalorder %s2314_s28, %s1978_s11  ;;  %p1983_p9 = scmp.lt.u32.totalorder %s2314_s28, %s2370_s5 }
 0x535   : > { %p1984_p12 = scmp.lt.u32.totalorder %s1982_s14, %s1978_s11  ;;  %p1986_p11 = scmp.lt.u32.totalorder %s1978_s11, %s2314_s28 }
 0x536   : > { %p1980_p6 = pnand %p1979_p5, %p2129_p4 }
 0x537   : > { %p1985_p10 = por %p1984_p12, %p1983_p9 }
 0x538   : > { %p1981_p7 = pneg %p1980_p6 }
 0x539   : > { %p1987_p13 = por %p1986_p11, %p1985_p10 }
 0x53b   : > { %p1988_p0 = pnand %p1987_p13, %p1981_p7 }
 0x53d   : > { %1991 = shalt.err (!%p1988_p0)
}
 0x53e   : > { %s2054_s17 = smov 64   ;;  %s2055_s19 = smov 4  }
 0x53f   : > { %1839 = dma.vmem_to_hbm [thread:$0]  (%p2129_p4), %s2309_s18, 128, %s2314_s28, %s2319_s30, %s2054_s17, %s2054_s17, %s2055_s19  }
 0x540 PF: > { %p1851_p1 = scmp.ge.s32.totalorder %s2046_s25, 2  ;;  %s1403_s1 = sand.u32 1, %s2026_s20  }
 0x541   : > { %s1404_s26 = scalar_lea.sflag [#allocation4], %s1403_s1 }
 0x542   : > { %p1846_p2 = pnand %p1851_p1, %p2136_p8 }
 0x544   : > { %2021 = dma.done.wait (!%p1846_p2), %s1404_s26, 128  }
 0x545   : > { %2023 = vsyncadd (!%p1846_p2), %s1404_s26, 4294967168  ;;  %s20_s25 = sadd.s32 1, %s2046_s25   ;;  %s2375_s20 = smov %s2030_s21 }
 0x546   : > { %p17_p3 = scmp.ge.s32.totalorder %s20_s25, 5   ;;  %s2376_s21 = smov %s2034_s22 }
 0x547   : > { %s2377_s22 = smov %s2142_s7  ;;  %s2378_s23 = smov %s2042_s24 }
 0x548   : > { %s2379_s24 = smov %s2381_s27  ;;  %19 = sbr.rel (!%p17_p3) target bundleno = 7 (0x7), region = 88 }
 0x54f   :  { %1409 = vsyncpa [#allocation4], 1 }
 0x550   :  { %1411 = vsyncpa [#allocation4 + $0x1], 1 }
 0x551   :  { %1412 = vsyncpa [#allocation5], 1 }
 0x552   :  { %1414 = vsyncpa [#allocation5 + $0x1], 1 }

</bundles_post_ra>
